<compile_context>
chip_gen: v7x
topology: tpu7x:2x2x1
jax: 0.10.0
libtpu: 0.0.40
codegen_flags: <defaults>
</compile_context>

<pallas_src>
import jax
import jax.numpy as jnp
from jax.experimental import pallas as pl
from jax.experimental.pallas import tpu as pltpu


# ~6 MiB of f32 working set per block (elements), and a floor so per-step
# fixed overhead stays well below the DMA time.
_MAX_BLOCK_ELEMS = (6 << 20) // 4
_MIN_BLOCK_ELEMS = 256 * 1024
_MIN_GRID_STEPS = 8  # enough steps for pipelining + megacore balance


def _round_up(x, m):
    return ((x + m - 1) // m) * m


def _plan_tiling(B, C, HW):
    """Choose (Bt, tile_hw, num_hw_tiles, hw_pad) for the (B, C, HW) view."""
    hw128 = _round_up(HW, 128)  # lane axis must be a multiple of 128

    max_lanes = max(128, ((_MAX_BLOCK_ELEMS // max(C, 1)) // 128) * 128)
    tile_hw = min(hw128, max_lanes)

    def n_tiles(t):
        return -(-hw128 // t)  # cdiv

    # If the grid would collapse to a couple of steps, shrink the lane tile
    # (never below a useful amount of work) so DMA pipelining and both
    # TensorCores (v7x megacore) get enough independent steps.
    while (B * n_tiles(tile_hw) < _MIN_GRID_STEPS
           and tile_hw > 128
           and C * (tile_hw // 2) >= _MIN_BLOCK_ELEMS):
        tile_hw = max(128, ((tile_hw // 2) // 128) * 128)

    num_hw_tiles = n_tiles(tile_hw)
    hw_pad = num_hw_tiles * tile_hw

    # Batch-block small images: fold several batch elements into one grid step
    # (the per-pixel channel reduction is unaffected by batching over B).
    bt = 1
    if num_hw_tiles == 1 and B > 1:
        per_b_elems = C * tile_hw
        max_bt = max(1, _MAX_BLOCK_ELEMS // max(per_b_elems, 1))
        max_bt = min(max_bt, max(1, B // 2))  # keep >= 2 steps for megacore
        for d in range(1, B + 1):
            if B % d == 0 and d <= max_bt:
                bt = d

    return bt, tile_hw, num_hw_tiles, hw_pad


def _make_layernorm_kernel(with_bias: bool, C: int, eps: float = 1e-5):
    inv_c = 1.0 / float(C)

    def kernel(x_ref, o_ref):
        # Block: (Bt, C, TILE_HW). Reduce over the channel (sublane) axis.
        x = x_ref[...].astype(jnp.float32)
        mu = jnp.sum(x, axis=1, keepdims=True) * inv_c          # (Bt, 1, T)
        xc = x - mu
        var = jnp.sum(xc * xc, axis=1, keepdims=True) * inv_c   # unbiased=False
        inv = jax.lax.rsqrt(var + eps)                          # EUP
        y = (xc * inv) if with_bias else (x * inv)
        o_ref[...] = y.astype(o_ref.dtype)

    return kernel


def layer_norm(x, layernorm_type: str = "WithBias", eps: float = 1e-5):
    """Histoformer LayerNorm. x: (B, C, H, W) -> (B, C, H, W)."""
    B, C, H, W = x.shape
    HW = H * W
    itemsize = jnp.dtype(x.dtype).itemsize

    bt, tile_hw, num_hw_tiles, hw_pad = _plan_tiling(B, C, HW)

    x3 = x.reshape(B, C, HW)
    if hw_pad != HW:
        # Zero-pad the pixel axis up to a multiple of the lane tile; padded
        # columns produce finite (unused) outputs and are sliced off below.
        x3 = jnp.pad(x3, ((0, 0), (0, 0), (0, hw_pad - HW)))

    kernel = _make_layernorm_kernel(
        with_bias=(layernorm_type != "BiasFree"), C=C, eps=eps
    )

    out3 = pl.pallas_call(
        kernel,
        out_shape=jax.ShapeDtypeStruct((B, C, hw_pad), x.dtype),
        grid_spec=pltpu.PrefetchScalarGridSpec(
            num_scalar_prefetch=0,
            grid=(B // bt, num_hw_tiles),
            in_specs=[pl.BlockSpec((bt, C, tile_hw), lambda b, t: (b, 0, t))],
            out_specs=pl.BlockSpec((bt, C, tile_hw), lambda b, t: (b, 0, t)),
        ),
        compiler_params=pltpu.CompilerParams(
            dimension_semantics=("parallel", "parallel"),
            # Explicit scoped-VMEM limit: big double-buffered tiles on every
            # generation while leaving headroom under v7x's 64 MiB physical.
            vmem_limit_bytes=48 << 20,
        ),
        cost_estimate=pl.CostEstimate(
            flops=7 * B * C * HW,
            transcendentals=B * HW,
            bytes_accessed=2 * B * C * HW * itemsize,
        ),
    )(x3)

    if hw_pad != HW:
        out3 = out3[:, :, :HW]
    return out3.reshape(B, C, H, W)


def _reference_layer_norm(x, layernorm_type: str = "WithBias", eps: float = 1e-5):
    # Pure-JAX reference mirroring the PyTorch code (normalize over channels).
    B, C, H, W = x.shape
    x3 = jnp.transpose(x.reshape(B, C, H * W), (0, 2, 1))  # b (hw) c
    mu = jnp.mean(x3, axis=-1, keepdims=True)
    var = jnp.mean((x3 - mu) ** 2, axis=-1, keepdims=True)
    if layernorm_type == "BiasFree":
        y = x3 / jnp.sqrt(var + eps)
    else:
        y = (x3 - mu) / jnp.sqrt(var + eps)
    return jnp.transpose(y, (0, 2, 1)).reshape(B, C, H, W)


if __name__ == "__main__":
    key = jax.random.PRNGKey(0)

    # Primary case: module-consistent small shape.
    B, C, H, W = 2, 4, 16, 16
    x = jax.random.normal(key, (B, C, H, W), dtype=jnp.float32)

    out = layer_norm(x, "WithBias")
    jax.block_until_ready(out)
    ref = _reference_layer_norm(x, "WithBias")
    assert out.shape == (B, C, H, W)
    assert jnp.max(jnp.abs(out - ref)) < 1e-4, "mismatch vs reference (WithBias)"

    out_bf = layer_norm(x, "BiasFree")
    jax.block_until_ready(out_bf)
    ref_bf = _reference_layer_norm(x, "BiasFree")
    assert jnp.max(jnp.abs(out_bf - ref_bf)) < 1e-4, "mismatch vs reference (BiasFree)"

    # Awkward spatial size (HW not a multiple of 128) exercises the pad path.
    x2 = jax.random.normal(jax.random.PRNGKey(1), (1, 4, 10, 10), dtype=jnp.float32)
    out2 = layer_norm(x2, "WithBias")
    jax.block_until_ready(out2)
    ref2 = _reference_layer_norm(x2, "WithBias")
    assert jnp.max(jnp.abs(out2 - ref2)) < 1e-4, "mismatch vs reference (padded HW)"

    print("KERNEL_OK")
</pallas_src>

<mosaic_0001>
module attributes {stable_mosaic.version = 11 : i64} {
  func.func @kernel(%arg0: i32, %arg1: i32, %arg2: memref<1x4x256xf32, #tpu.memory_space<vmem>>, %arg3: memref<1x4x256xf32, #tpu.memory_space<vmem>>) attributes {dimension_semantics = [#tpu.dimension_semantics<parallel>, #tpu.dimension_semantics<parallel>], iteration_bounds = array<i64: 2, 1>, scalar_prefetch = 0 : i64, scratch_operands = 0 : i64, tpu.core_type = #tpu.core_type<tc>, window_params = [{transform_indices = @transform_0, window_bounds = array<i64: 1, 4, 256>}, {transform_indices = @transform_1, window_bounds = array<i64: 1, 4, 256>}]} {
    %c0 = arith.constant 0 : index
    %c0_0 = arith.constant 0 : index
    %c0_1 = arith.constant 0 : index
    %0 = vector.load %arg2[%c0, %c0_0, %c0_1] : memref<1x4x256xf32, #tpu.memory_space<vmem>>, vector<1x4x256xf32>
    %cst = arith.constant dense<0.000000e+00> : vector<1x256xf32>
    %1 = vector.multi_reduction <add>, %0, %cst [1] : vector<1x4x256xf32> to vector<1x256xf32>
    %2 = vector.shape_cast %1 : vector<1x256xf32> to vector<1x1x256xf32>
    %cst_2 = arith.constant 2.500000e-01 : f32
    %3 = vector.broadcast %cst_2 : f32 to vector<1x1x256xf32>
    %4 = arith.mulf %2, %3 : vector<1x1x256xf32>
    %5 = vector.broadcast %4 : vector<1x1x256xf32> to vector<1x4x256xf32>
    %6 = arith.subf %0, %5 : vector<1x4x256xf32>
    %7 = arith.mulf %6, %6 : vector<1x4x256xf32>
    %cst_3 = arith.constant dense<0.000000e+00> : vector<1x256xf32>
    %8 = vector.multi_reduction <add>, %7, %cst_3 [1] : vector<1x4x256xf32> to vector<1x256xf32>
    %9 = vector.shape_cast %8 : vector<1x256xf32> to vector<1x1x256xf32>
    %cst_4 = arith.constant 2.500000e-01 : f32
    %10 = vector.broadcast %cst_4 : f32 to vector<1x1x256xf32>
    %11 = arith.mulf %9, %10 : vector<1x1x256xf32>
    %cst_5 = arith.constant 9.99999974E-6 : f32
    %12 = vector.broadcast %cst_5 : f32 to vector<1x1x256xf32>
    %13 = arith.addf %11, %12 : vector<1x1x256xf32>
    %14 = math.rsqrt %13 : vector<1x1x256xf32>
    %15 = vector.broadcast %14 : vector<1x1x256xf32> to vector<1x4x256xf32>
    %16 = arith.mulf %6, %15 : vector<1x4x256xf32>
    %c0_6 = arith.constant 0 : index
    %c0_7 = arith.constant 0 : index
    %c0_8 = arith.constant 0 : index
    %17 = vector.load %arg3[%c0_6, %c0_7, %c0_8] : memref<1x4x256xf32, #tpu.memory_space<vmem>>, vector<1x4x256xf32>
    tpu.vector_store %arg3[%c0_6, %c0_7, %c0_8], %16 {strides = array<i32>} : memref<1x4x256xf32, #tpu.memory_space<vmem>>, vector<1x4x256xf32>,
    return
  }
  func.func @transform_0(%arg0: i32, %arg1: i32) -> (i32, i32, i32) {
    %c0_i32 = arith.constant 0 : i32
    %c0_i32_0 = arith.constant 0 : i32
    return %arg0, %c0_i32, %arg1 : i32, i32, i32
  }
  func.func @transform_1(%arg0: i32, %arg1: i32) -> (i32, i32, i32) {
    %c0_i32 = arith.constant 0 : i32
    %c0_i32_0 = arith.constant 0 : i32
    return %arg0, %c0_i32, %arg1 : i32, i32, i32
  }
}

</mosaic_0001>

<bundles_post_ra>
// kernel: tpu_custom_call.1
= control target key start
LH: loop header
LB: loop body
LE: loop exit
PB: predicated region body
PF: predicated region fallthrough
CT: control target
= control target key end

     0   :  { %6 = vsyncpa [#allocation3], 0  ;;  %s700_s0 = inlined_call_operand.hbm [shape: f32[2,4,256], index: 0, kind: input, shape index: {}]   ;;  %s701_s1 = inlined_call_operand.hbm [shape: f32[2,4,256], index: 1, kind: output, shape index: {}]  }
   0x1   :  { %8 = vsyncpa [#allocation3 + $0x1], 0 }
   0x2   :  { %9 = vsyncpa [#allocation4], 0 }
   0x3   :  { %11 = vsyncpa [#allocation4 + $0x1], 0  ;;  %s520_s6 = smov 0   ;;  %s522_s7 = smov 0  }
   0x4   :  { %s524_s8 = smov 0   ;;  %s526_s9 = smov 0  }
   0x5   :  { %s528_s10 = smov 0   ;;  %s530_s11 = smov 0  }
   0x6 LB: > { %s310_s12 = sadd.s32 4294967295, %s506_s11   ;;  %s311_s13 = sadd.s32 4294967294, %s506_s11   ;;  %s506_s11 = sphi %s530_s11, %s17_s11   ;;  %s502_s10 = sphi %s528_s10, %s717_s10   ;;  %s498_s9 = sphi %s526_s9, %s716_s9   ;;  %s494_s8 = sphi %s524_s8, %s715_s8   ;;  %s490_s7 = sphi %s522_s7, %s714_s7   ;;  %s486_s6 = sphi %s520_s6, %s713_s6  }
   0x7   : > { %s29_s14 = sadd.s32 1, %s502_s10  ;;  %s38_s15 = sadd.s32 1, %s494_s8 }
   0x8   : > { %p31_p0 = scmp.ge.s32.totalorder %s29_s14, 2  ;;  %p45_p1 = scmp.ne.s32.totalorder %s494_s8, %s490_s7 }
   0x9   : > { %p46_p2 = scmp.eq.s32.totalorder %s506_s11, 0  ;;  %p51_p3 = scmp.ne.s32.totalorder %s490_s7, %s486_s6 }
   0xa   : > { %s719_s14 = smov (%p31_p0, %s29_s14), 0  ;;  %p52_p5 = scmp.eq.s32.totalorder %s310_s12, 0 }
   0xb   : > { %p561_p4 = por %p46_p2, %p45_p1  ;;  %s33_s17 = ssub.s32 %s502_s10, %s719_s14 }
   0xc   : > { %p77_p6 = scmp.eq.s32.totalorder %s310_s12, 1  ;;  %p36_p7 = scmp.eq.s32.totalorder %s33_s17, 0 }
   0xd   : > { %p567_p8 = por %p52_p5, %p51_p3  ;;  %p83_p10 = scmp.eq.s32.totalorder %s311_s13, 1 }
   0xe   : > { %p571_p9 = por %p77_p6, %p45_p1  ;;  %p339_p13 = scmp.lt.s32.totalorder %s506_s11, 2 }
   0xf   : > { %s576_s20 = scalar_select %p36_p7, %s494_s8, %s38_s15  }
  0x10   : > { %s705_s19 = scalar_select %p571_p9, 1, 0 }
  0x11   : > { %p578_p11 = por %p83_p10, %p51_p3  ;;  %s103_s22 = sand.u32 1, %s494_s8  }
  0x12   : > { %s314_s23 = sshll.u32 %s103_s22, 3  ;;  %s325_s24 = sshll.u32 %s502_s10, 7 }
  0x13   : > { %s706_s21 = scalar_select %p578_p11, 1, 0 }
  0x14   : > { %s589_s27 = scalar_lea.hbm %s700_s0, %s325_s24  ;;  %s107_s28 = scalar_lea.vmem [#allocation2], %s314_s23 }
  0x15   : > { %s117_s29 = sshll.u32 %s107_s28, 4  ;;  %p595_p0 = pnand %p339_p13, %p561_p4  ;;  %s591_s29 = int_to_ptr.vmem [resolvable:$true] %s117_s29 }
  0x16   : > { %s104_s2 = scalar_lea.sflag [#allocation3], %s103_s22  ;;  %s394_s3 = scalar_lea.hbm %s589_s27, 128 }
  0x17   : > { %p395_p3 = scmp.ne.s32.totalorder %s589_s27, %s394_s3  ;;  %p396_p5 = pneg %p595_p0 }
  0x18   : > { %s399_s12 = scalar_lea.hbm %s700_s0, 256  ;;  %p400_p4 = scmp.lt.u32.totalorder %s589_s27, %s700_s0 }
  0x19   : > { %p397_p6 = pnand %p396_p5, %p395_p3  ;;  %p401_p10 = scmp.lt.u32.totalorder %s399_s12, %s394_s3 }
  0x1a   : > { %p403_p12 = scmp.lt.u32.totalorder %s394_s3, %s589_s27 }
  0x1b   : > { %p398_p7 = pneg %p397_p6  ;;  %p402_p13 = por %p401_p10, %p400_p4 }
  0x1d   : > { %p404_p1 = por %p403_p12, %p402_p13 }
  0x1f   : > { %p405_p2 = pnand %p404_p1, %p398_p7 }
  0x21   : > { %408 = shalt.err (!%p405_p2)
}
  0x22   : > { %s409_s16 = scalar_lea.vmem %s591_s29, 128  ;;  %s508_s17 = smov [#allocation2]  }
  0x23   : > { %p410_p3 = scmp.ne.s32.totalorder %s591_s29, %s409_s16  ;;  %s414_s22 = sshll.u32 %s508_s17, 4  ;;  %s415_s22 = int_to_ptr.vmem [resolvable:$false] %s414_s22 }
  0x24   : > { %s416_s23 = scalar_lea.vmem %s415_s22, 256  ;;  %p417_p9 = scmp.lt.s32.totalorder %s591_s29, %s415_s22 }
  0x25   : > { %p412_p6 = pnand %p410_p3, %p396_p5  ;;  %p418_p4 = scmp.lt.s32.totalorder %s416_s23, %s409_s16 }
  0x27   : > { %p413_p11 = pneg %p412_p6  ;;  %p419_p10 = por %p418_p4, %p417_p9 }
  0x29   : > { %p420_p12 = pnand %p419_p10, %p413_p11 }
  0x2b   : > { %423 = shalt.err (!%p420_p12)
}
  0x2c   : > { %334 = dma.hbm_to_vmem [thread:$0]  (!%p595_p0), %s589_s27, 128, %s591_s29, %s104_s2  }
  0x2d   : > { %p708_p1 = scmp.lt.s32.totalorder %s506_s11, 3  ;;  %p709_p2 = scmp.ge.s32.totalorder %s506_s11, 1 }
  0x2f   : > { %p123_p5 = pnand %p709_p2, %p708_p1 }
  0x30   : > { %s631_s24 = sand.u32 (!%p123_p5), 1, %s490_s7  }
  0x31   : > { %126 = sbr.rel (%p123_p5) target bundleno = 129 (0x81), region = 24  ;;  %s318_s25 = sshll.u32 (!%p123_p5), %s631_s24, 3 }
  0x32   : > { %s129_s26 = scalar_lea.sflag (!%p123_p5), [#allocation3], %s631_s24  ;;  %s132_s28 = scalar_lea.vmem (!%p123_p5), [#allocation2], %s318_s25 }
  0x38   : > { %477 = dma.done.wait (%p567_p8), %s129_s26, 128  }
  0x39   : > { %479 = vsyncadd (%p567_p8), %s129_s26, 4294967168  ;;  %vm157_vm0 = vcmask 1043456   ;;  %v153_v0 = vld [vmem:[%s132_s28] sm:$0xff]  ;;  %s150_s18 = scalar_lea.vmem [#allocation5], %s318_s25  ;;  %s326_s29 = sshll.u32 %s498_s9, 7 }
  0x3a   : > { %v155_v1 = vcombine.high %v153_v0, %v153_v0  ;;  %v158_v2 = vsel %vm157_vm0, %v153_v0, 0.0  ;;  %s226_s27 = sshll.u32 %s150_s18, 4  ;;  %s653_s3 = scalar_lea.hbm %s701_s1, %s326_s29  ;;  %s648_s27 = int_to_ptr.vmem [resolvable:$true] %s226_s27 }
  0x3b   : > { %v159_v3 = vrot.slane %v158_v2, 4  ;;  %s210_s4 = scalar_lea.sflag [#allocation4], %s631_s24  ;;  %s424_s5 = scalar_lea.vmem %s648_s27, 128 }
  0x3c   : > { %v165_v4 = vsel %vm157_vm0, %v155_v1, 0.0  ;;  %p425_p8 = scmp.ne.s32.totalorder %s648_s27, %s424_s5  ;;  %p710_p9 = scmp.ne.s32.totalorder %s705_s19, 0 }
  0x3d   : > { %v160_v5 = vadd.f32 %v159_v3, %v158_v2  ;;  %v166_v6 = vrot.slane %v165_v4, 4  ;;  %s509_s9 = smov [#allocation5]  }
  0x3e   : > { %p426_p11 = pnand %p425_p8, %p710_p9  ;;  %s428_s12 = sshll.u32 %s509_s9, 4  ;;  %s429_s12 = int_to_ptr.vmem [resolvable:$false] %s428_s12 }
  0x3f   : > { %v161_v7 = vrot.slane %v160_v5, 2  ;;  %v167_v8 = vadd.f32 %v166_v6, %v165_v4  ;;  %s430_s13 = scalar_lea.vmem %s429_s12, 256  ;;  %p431_p7 = scmp.lt.s32.totalorder %s648_s27, %s429_s12 }
  0x40   : > { %p427_p0 = pneg %p426_p11  ;;  %p432_p13 = scmp.lt.s32.totalorder %s430_s13, %s424_s5 }
  0x41   : > { %v162_v9 = vadd.f32 %v161_v7, %v160_v5  ;;  %v168_v10 = vrot.slane %v167_v8, 2 }
  0x42   : > { %p433_p3 = por %p432_p13, %p431_p7 }
  0x43   : > { %v163_v11 = vrot.slane %v162_v9, 1  ;;  %v169_v12 = vadd.f32 %v168_v10, %v167_v8 }
  0x44   : > { %p434_p6 = pnand %p433_p3, %p427_p0 }
  0x45   : > { %v164_v13 = vadd.f32 %v163_v11, %v162_v9  ;;  %v170_v14 = vrot.slane %v169_v12, 1 }
  0x47   : > { %v171_v15 = vadd.f32 %v170_v14, %v169_v12  ;;  %v172_v16 = vmul.f32 0.25, %v164_v13 }
  0x49   : > { %v173_v17 = vmul.f32 0.25, %v171_v15 }
  0x4b   : > { %v176_v18 = vcombine.low %v172_v16, %v173_v17 }
  0x4d   : > { %v178_v19 = vsub.f32 %v153_v0, %v176_v18 }
  0x4f   : > { %v179_v20 = vmul.f32 %v178_v19, %v178_v19 }
  0x51   : > { %v181_v21 = vcombine.high %v179_v20, %v179_v20  ;;  %v183_v22 = vsel %vm157_vm0, %v179_v20, 0.0 }
  0x52   : > { %v184_v23 = vrot.slane %v183_v22, 4 }
  0x53   : > { %v190_v24 = vsel %vm157_vm0, %v181_v21, 0.0 }
  0x54   : > { %v185_v25 = vadd.f32 %v184_v23, %v183_v22  ;;  %v191_v26 = vrot.slane %v190_v24, 4 }
  0x56   : > { %v186_v27 = vrot.slane %v185_v25, 2  ;;  %v192_v28 = vadd.f32 %v191_v26, %v190_v24 }
  0x58   : > { %v187_v29 = vadd.f32 %v186_v27, %v185_v25  ;;  %v193_v30 = vrot.slane %v192_v28, 2 }
  0x5a   : > { %v188_v31 = vrot.slane %v187_v29, 1  ;;  %v194_v32 = vadd.f32 %v193_v30, %v192_v28 }
  0x5c   : > { %v189_v33 = vadd.f32 %v188_v31, %v187_v29  ;;  %v195_v34 = vrot.slane %v194_v32, 1 }
  0x5e   : > { %v196_v35 = vadd.f32 %v195_v34, %v194_v32  ;;  %v197_v36 = vmul.f32 0.25, %v189_v33 }
  0x60   : > { %v198_v37 = vmul.f32 0.25, %v196_v35  ;;  %v199_v38 = vadd.f32 1e-05, %v197_v36 }
  0x62   : > { %v200_v39 = vadd.f32 1e-05, %v198_v37  ;;  %390 = vrsqrt.f32 %v199_v38 }
  0x64   : > { %392 = vrsqrt.f32 %v200_v39 }
  0x6c   : > { %v391_v40 = vpop.eup %390 }
  0x6e   : > { %v393_v41 = vpop.eup %392 }
  0x6f   : > { %v205_v42 = vcombine.low %v391_v40, %v393_v41 }
  0x71   : > { %v207_v43 = vmul.f32 %v205_v42, %v178_v19 }
  0x73   : > { %208 = vst [vmem:[%s150_s18] sm:$0xff] %v207_v43 }
  0x74   : > { %437 = shalt.err (!%p434_p6)
}
  0x75   : > { %s438_s15 = scalar_lea.hbm %s653_s3, 128  ;;  %s442_s22 = scalar_lea.hbm %s701_s1, 256 }
  0x76   : > { %p439_p4 = scmp.ne.s32.totalorder %s653_s3, %s438_s15  ;;  %p443_p1 = scmp.lt.u32.totalorder %s653_s3, %s701_s1 }
  0x77   : > { %p444_p2 = scmp.lt.u32.totalorder %s442_s22, %s438_s15  ;;  %p446_p8 = scmp.lt.u32.totalorder %s438_s15, %s653_s3 }
  0x78   : > { %p440_p10 = pnand %p439_p4, %p710_p9 }
  0x79   : > { %p445_p5 = por %p444_p2, %p443_p1 }
  0x7a   : > { %p441_p12 = pneg %p440_p10 }
  0x7b   : > { %p447_p11 = por %p446_p8, %p445_p5 }
  0x7d   : > { %p448_p0 = pnand %p447_p11, %p441_p12 }
  0x7f   : > { %451 = shalt.err (!%p448_p0)
}
  0x80   : > { %329 = dma.vmem_to_hbm [thread:$0]  (%p710_p9), %s648_s27, 128, %s653_s3, %s210_s4  }
  0x81 PF: > { %s238_s25 = sand.u32 1, %s486_s6   ;;  %p711_p7 = scmp.ne.s32.totalorder %s706_s21, 0 }
  0x82   : > { %p712_p13 = scmp.ge.s32.totalorder %s506_s11, 2  ;;  %s239_s26 = scalar_lea.sflag [#allocation4], %s238_s25 }
  0x84   : > { %p336_p3 = pnand %p712_p13, %p711_p7 }
  0x86   : > { %481 = dma.done.wait (!%p336_p3), %s239_s26, 128  }
  0x87   : > { %483 = vsyncadd (!%p336_p3), %s239_s26, 4294967168  ;;  %s17_s11 = sadd.s32 1, %s506_s11   ;;  %s713_s6 = smov %s490_s7 }
  0x88   : > { %p14_p6 = scmp.ge.s32.totalorder %s17_s11, 4   ;;  %s714_s7 = smov %s494_s8 }
  0x89   : > { %s715_s8 = smov %s576_s20  ;;  %s716_s9 = smov %s502_s10 }
  0x8a   : > { %s717_s10 = smov %s719_s14  ;;  %16 = sbr.rel (!%p14_p6) target bundleno = 6 (0x6), region = 69 }
  0x91   :  { %244 = vsyncpa [#allocation3], 1 }
  0x92   :  { %246 = vsyncpa [#allocation3 + $0x1], 1 }
  0x93   :  { %247 = vsyncpa [#allocation4], 1 }
  0x94   :  { %249 = vsyncpa [#allocation4 + $0x1], 1 }

</bundles_post_ra>
